<compile_context>
chip_gen: v7x
topology: tpu7x:2x2x1
jax: 0.10.0
libtpu: 0.0.40
codegen_flags: <defaults>
</compile_context>

<pallas_src>
import jax
import jax.numpy as jnp
from jax import lax
from jax.experimental import pallas as pl
from jax.experimental.pallas import tpu as pltpu


def _make_self_attention_kernel(C, C8p):
    def kernel(x_ref, w_ref, b_ref, gamma_ref, o_ref):
        gamma = gamma_ref[0]
        x = x_ref[0]                       # (C, L) f32, one batch element per step
        xb = x.astype(jnp.bfloat16)
        w = w_ref[...]                     # (R, C) bf16, resident across grid steps
        b = b_ref[...]                     # (R, 1) f32

        # Fused 1x1-conv projection: ONE matmul per grid step, static row slices after.
        qkv = jnp.dot(w, xb, preferred_element_type=jnp.float32) + b
        q = qkv[:C8p]                      # (C8p, L)  (rows >= C8 are exactly zero)
        k = qkv[C8p:2 * C8p]               # (C8p, L)
        v = qkv[2 * C8p:]                  # (C,   L)

        # scores s[i, j] = sum_o q[o, i] * k[o, j]   -> contract axis 0 vs 0
        s = lax.dot_general(
            q.astype(jnp.bfloat16), k.astype(jnp.bfloat16),
            (((0,), (0,)), ((), ())),
            preferred_element_type=jnp.float32)            # (L, L)

        # softmax over last axis (torch dim=2), elementwise math in f32
        s = s - jnp.max(s, axis=-1, keepdims=True)
        p = jnp.exp(s)
        a = p * pl.reciprocal(jnp.sum(p, axis=-1, keepdims=True), approx=True)

        # out[c, i] = sum_j v[c, j] * a[i, j]         -> contract axis 1 vs 1
        out = lax.dot_general(
            v.astype(jnp.bfloat16), a.astype(jnp.bfloat16),
            (((1,), (1,)), ((), ())),
            preferred_element_type=jnp.float32)            # (C, L)

        o_ref[0] = (gamma * out + x).astype(o_ref.dtype)

    return kernel


def fuse_qkv_params(wq, bq, wk, bk, wv, bv):
    """One-time host-side fusion of the three Conv1d(k=1) projections.

    Call once and reuse the result; keeps concat/pad/cast out of the per-call path.
    Returns (w_fused bf16 (R, C), b_fused f32 (R, 1), C8p).
    """
    C = wv.shape[0]
    C8 = wq.shape[0]
    # Pad q/k out-channels to a clean sublane multiple (>= 8). Padded rows are
    # zero weights + zero bias => zero q/k rows => contribute 0 to q^T k.
    C8p = max(8, ((C8 + 7) // 8) * 8)

    def pad_rows(a, rows):
        if a.shape[0] >= rows:
            return a
        pad = jnp.zeros((rows - a.shape[0],) + a.shape[1:], a.dtype)
        return jnp.concatenate([a, pad], axis=0)

    w_fused = jnp.concatenate(
        [pad_rows(wq, C8p), pad_rows(wk, C8p), wv], axis=0
    ).astype(jnp.bfloat16)                                  # (2*C8p + C, C)
    b_fused = jnp.concatenate(
        [pad_rows(bq, C8p), pad_rows(bk, C8p), bv], axis=0
    ).astype(jnp.float32)                                   # (2*C8p + C, 1)
    return w_fused, b_fused, C8p


def self_attention_pallas(x, w_fused, b_fused, gamma, C8p):
    B, C, L = x.shape
    R = w_fused.shape[0]

    kernel = _make_self_attention_kernel(C, C8p)

    # One batch element per grid step: B steps -> DMA/compute overlap via the
    # auto-pipeline, and work is sharded across TensorCores on megacore parts.
    return pl.pallas_call(
        kernel,
        out_shape=jax.ShapeDtypeStruct((B, C, L), x.dtype),
        grid_spec=pltpu.PrefetchScalarGridSpec(
            num_scalar_prefetch=0,
            grid=(B,),
            in_specs=[
                pl.BlockSpec((1, C, L), lambda g: (g, 0, 0)),       # x
                pl.BlockSpec((R, C), lambda g: (0, 0)),             # fused W (bf16)
                pl.BlockSpec((R, 1), lambda g: (0, 0)),             # fused bias (f32)
                pl.BlockSpec(memory_space=pltpu.MemorySpace.SMEM),  # gamma scalar
            ],
            out_specs=pl.BlockSpec((1, C, L), lambda g: (g, 0, 0)),
        ),
        compiler_params=pltpu.CompilerParams(
            dimension_semantics=("parallel",)),
    )(x, w_fused, b_fused, gamma)


def self_attention_ref(x, wq, bq, wk, bk, wv, bv, gamma):
    q = jnp.einsum('oc,bcl->bol', wq, x) + bq[None]
    k = jnp.einsum('oc,bcl->bol', wk, x) + bk[None]
    v = jnp.einsum('oc,bcl->bol', wv, x) + bv[None]
    s = jnp.einsum('boi,boj->bij', q, k)
    a = jax.nn.softmax(s, axis=-1)
    o = jnp.einsum('bcj,bij->bci', v, a)
    return gamma[0] * o + x


if __name__ == "__main__":
    B, C, L = 2, 16, 128           # in_channels must be >= 8 (C // 8 projection)
    C8 = C // 8

    key = jax.random.PRNGKey(0)
    kx, kq, kbq, kk, kbk, kv, kbv = jax.random.split(key, 7)

    x = jax.random.normal(kx, (B, C, L), dtype=jnp.float32)

    # Conv1d(k=1) weights: (out_ch, in_ch); biases kept as (out_ch, 1) for lane broadcast.
    wq = jax.random.normal(kq, (C8, C), dtype=jnp.float32) * 0.1
    bq = jax.random.normal(kbq, (C8, 1), dtype=jnp.float32) * 0.1
    wk = jax.random.normal(kk, (C8, C), dtype=jnp.float32) * 0.1
    bk = jax.random.normal(kbk, (C8, 1), dtype=jnp.float32) * 0.1
    wv = jax.random.normal(kv, (C, C), dtype=jnp.float32) * 0.1
    bv = jax.random.normal(kbv, (C, 1), dtype=jnp.float32) * 0.1
    # nn.Parameter(torch.zeros(1)) in the module; set nonzero here so the attention
    # path is actually exercised (deterministic, in-script).
    gamma = jnp.array([0.5], dtype=jnp.float32)

    # One-time parameter fusion (kept out of the per-call path).
    w_fused, b_fused, C8p = fuse_qkv_params(wq, bq, wk, bk, wv, bv)
    w_fused = jax.block_until_ready(w_fused)
    b_fused = jax.block_until_ready(b_fused)

    out = self_attention_pallas(x, w_fused, b_fused, gamma, C8p)
    out = jax.block_until_ready(out)

    ref = self_attention_ref(x, wq, bq, wk, bk, wv, bv, gamma)
    assert out.shape == (B, C, L)
    # Tolerance loosened for bf16 MXU operands + approx reciprocal.
    assert jnp.allclose(out, ref, atol=2e-2, rtol=2e-2), "mismatch vs reference"

    print("KERNEL_OK")
</pallas_src>

<mosaic_0001>
module attributes {stable_mosaic.version = 11 : i64} {
  func.func @kernel(%arg0: i32, %arg1: memref<1x16x128xf32, #tpu.memory_space<vmem>>, %arg2: memref<32x16xbf16, #tpu.memory_space<vmem>>, %arg3: memref<32x1xf32, #tpu.memory_space<vmem>>, %arg4: memref<1xf32, #tpu.memory_space<smem>>, %arg5: memref<1x16x128xf32, #tpu.memory_space<vmem>>) attributes {dimension_semantics = [#tpu.dimension_semantics<parallel>], iteration_bounds = array<i64: 2>, scalar_prefetch = 0 : i64, scratch_operands = 0 : i64, tpu.core_type = #tpu.core_type<tc>, window_params = [{transform_indices = @transform_0, window_bounds = array<i64: 1, 16, 128>}, {pipeline_mode = #tpu.pipeline_mode<synchronous>, transform_indices = @transform_1, window_bounds = array<i64: 32, 16>}, {pipeline_mode = #tpu.pipeline_mode<synchronous>, transform_indices = @transform_2, window_bounds = array<i64: 32, 1>}, {transform_indices = @transform_3, window_bounds = array<i64: 1>}, {transform_indices = @transform_4, window_bounds = array<i64: 1, 16, 128>}]} {
    %c0 = arith.constant 0 : index
    %0 = memref.load %arg4[%c0] : memref<1xf32, #tpu.memory_space<smem>>
    %c0_0 = arith.constant 0 : index
    %c0_1 = arith.constant 0 : index
    %c0_2 = arith.constant 0 : index
    %1 = vector.load %arg1[%c0_0, %c0_1, %c0_2] : memref<1x16x128xf32, #tpu.memory_space<vmem>>, vector<1x16x128xf32>
    %2 = vector.shape_cast %1 : vector<1x16x128xf32> to vector<16x128xf32>
    %3 = arith.truncf %2 : vector<16x128xf32> to vector<16x128xbf16>
    %c0_3 = arith.constant 0 : index
    %c0_4 = arith.constant 0 : index
    %4 = vector.load %arg2[%c0_3, %c0_4] : memref<32x16xbf16, #tpu.memory_space<vmem>>, vector<32x16xbf16>
    %c0_5 = arith.constant 0 : index
    %c0_6 = arith.constant 0 : index
    %5 = vector.load %arg3[%c0_5, %c0_6] : memref<32x1xf32, #tpu.memory_space<vmem>>, vector<32x1xf32>
    %cst = arith.constant dense<0.000000e+00> : vector<32x128xf32>
    %6 = tpu.matmul %4, %3, %cst {dimension_numbers = #tpu.dot_dimension_numbers<[1], [0], [0], [1], [0, 0, 1, 1], [], []>} : vector<32x16xbf16>, vector<16x128xbf16>, vector<32x128xf32> -> vector<32x128xf32>
    %7 = vector.broadcast %5 : vector<32x1xf32> to vector<32x128xf32>
    %8 = arith.addf %6, %7 : vector<32x128xf32>
    %9 = vector.extract_strided_slice %8 {offsets = [0, 0], sizes = [8, 128], strides = [1, 1]} : vector<32x128xf32> to vector<8x128xf32>
    %10 = vector.extract_strided_slice %8 {offsets = [8, 0], sizes = [8, 128], strides = [1, 1]} : vector<32x128xf32> to vector<8x128xf32>
    %11 = vector.extract_strided_slice %8 {offsets = [16, 0], sizes = [16, 128], strides = [1, 1]} : vector<32x128xf32> to vector<16x128xf32>
    %12 = arith.truncf %9 : vector<8x128xf32> to vector<8x128xbf16>
    %13 = arith.truncf %10 : vector<8x128xf32> to vector<8x128xbf16>
    %cst_7 = arith.constant dense<0.000000e+00> : vector<128x128xf32>
    %14 = tpu.matmul %12, %13, %cst_7 {dimension_numbers = #tpu.dot_dimension_numbers<[0], [0], [1], [1], [0, 1, 1, 1], [], []>} : vector<8x128xbf16>, vector<8x128xbf16>, vector<128x128xf32> -> vector<128x128xf32>
    %cst_8 = arith.constant dense<0xFF800000> : vector<128xf32>
    %15 = vector.multi_reduction <maximumf>, %14, %cst_8 [1] : vector<128x128xf32> to vector<128xf32>
    %16 = vector.shape_cast %15 : vector<128xf32> to vector<128x1xf32>
    %17 = vector.broadcast %16 : vector<128x1xf32> to vector<128x128xf32>
    %18 = arith.subf %14, %17 : vector<128x128xf32>
    %19 = math.exp %18 : vector<128x128xf32>
    %cst_9 = arith.constant dense<0.000000e+00> : vector<128xf32>
    %20 = vector.multi_reduction <add>, %19, %cst_9 [1] : vector<128x128xf32> to vector<128xf32>
    %21 = vector.shape_cast %20 : vector<128xf32> to vector<128x1xf32>
    %22 = tpu.reciprocal %21 {approx = true} : vector<128x1xf32> -> vector<128x1xf32>
    %23 = vector.broadcast %22 : vector<128x1xf32> to vector<128x128xf32>
    %24 = arith.mulf %19, %23 : vector<128x128xf32>
    %25 = arith.truncf %11 : vector<16x128xf32> to vector<16x128xbf16>
    %26 = arith.truncf %24 : vector<128x128xf32> to vector<128x128xbf16>
    %cst_10 = arith.constant dense<0.000000e+00> : vector<16x128xf32>
    %27 = tpu.matmul %25, %26, %cst_10 {dimension_numbers = #tpu.dot_dimension_numbers<[1], [1], [0], [0], [0, 0, 1, 0], [], []>} : vector<16x128xbf16>, vector<128x128xbf16>, vector<16x128xf32> -> vector<16x128xf32>
    %28 = vector.broadcast %0 : f32 to vector<16x128xf32>
    %29 = arith.mulf %28, %27 : vector<16x128xf32>
    %30 = arith.addf %29, %2 : vector<16x128xf32>
    %c0_11 = arith.constant 0 : index
    %c0_12 = arith.constant 0 : index
    %c0_13 = arith.constant 0 : index
    %31 = vector.load %arg5[%c0_11, %c0_12, %c0_13] : memref<1x16x128xf32, #tpu.memory_space<vmem>>, vector<1x16x128xf32>
    %32 = vector.shape_cast %31 : vector<1x16x128xf32> to vector<16x128xf32>
    %33 = vector.shape_cast %30 : vector<16x128xf32> to vector<1x16x128xf32>
    tpu.vector_store %arg5[%c0_11, %c0_12, %c0_13], %33 {strides = array<i32>} : memref<1x16x128xf32, #tpu.memory_space<vmem>>, vector<1x16x128xf32>,
    return
  }
  func.func @transform_0(%arg0: i32) -> (i32, i32, i32) {
    %c0_i32 = arith.constant 0 : i32
    %c0_i32_0 = arith.constant 0 : i32
    %c0_i32_1 = arith.constant 0 : i32
    return %arg0, %c0_i32, %c0_i32_0 : i32, i32, i32
  }
  func.func @transform_1(%arg0: i32) -> (i32, i32) {
    %c0_i32 = arith.constant 0 : i32
    %c0_i32_0 = arith.constant 0 : i32
    %c0_i32_1 = arith.constant 0 : i32
    return %c0_i32, %c0_i32_0 : i32, i32
  }
  func.func @transform_2(%arg0: i32) -> (i32, i32) {
    %c0_i32 = arith.constant 0 : i32
    %c0_i32_0 = arith.constant 0 : i32
    %c0_i32_1 = arith.constant 0 : i32
    return %c0_i32, %c0_i32_0 : i32, i32
  }
  func.func @transform_3(%arg0: i32) -> i32 {
    %c0_i32 = arith.constant 0 : i32
    %c0_i32_0 = arith.constant 0 : i32
    return %c0_i32 : i32
  }
  func.func @transform_4(%arg0: i32) -> (i32, i32, i32) {
    %c0_i32 = arith.constant 0 : i32
    %c0_i32_0 = arith.constant 0 : i32
    %c0_i32_1 = arith.constant 0 : i32
    return %arg0, %c0_i32, %c0_i32_0 : i32, i32, i32
  }
}

</mosaic_0001>

<bundles_post_ra>
// kernel: tpu_custom_call.1
= control target key start
LH: loop header
LB: loop body
LE: loop exit
PB: predicated region body
PF: predicated region fallthrough
CT: control target
= control target key end

     0   :  { %s1261_s0 = inlined_call_operand.vmem [shape: f32[2,16,128], index: 0, kind: input, shape index: {}]   ;;  %s1262_s1 = inlined_call_operand.vmem [shape: bf16[32,16], index: 1, kind: input, shape index: {}]   ;;  %s1263_s2 = inlined_call_operand.vmem [shape: f32[32,1], index: 2, kind: input, shape index: {}]   ;;  %s1264_s3 = inlined_call_operand.<no memory space> [shape: f32[1], index: 3, kind: input, shape index: {}]   ;;  %s1265_s4 = inlined_call_operand.hbm [shape: f32[2,16,128], index: 4, kind: output, shape index: {}]  }
   0x1   :  { %9 = sst [smem:[#allocation2]] %s1264_s3 }
   0x2   :  { %10 = vsyncpa [#allocation4], 0 }
   0x3   :  { %12 = vsyncpa [#allocation4 + $0x1], 0  ;;  %s1019_s17 = smov 0   ;;  %s1021_s18 = smov 0  }
   0x4   :  { %s1023_s19 = smov 0   ;;  %s1025_s20 = smov 0  }
   0x5 LB: > { %s1040_s3 = sadd.s32 4294967295, %s983_s20   ;;  %s717_s21 = sadd.s32 4294967294, %s983_s20   ;;  %s983_s20 = sphi %s1025_s20, %s1271_s20   ;;  %s979_s19 = sphi %s1023_s19, %s1270_s19   ;;  %s975_s18 = sphi %s1021_s18, %s1269_s18   ;;  %s971_s17 = sphi %s1019_s17, %s1268_s17  }
   0x6   : > { %s1044_s22 = sadd.s32 1, %s983_s20   ;;  %s114_s23 = sadd.s32 1, %s979_s19 }
   0x7   : > { %s111_s24 = ssub.s32 %s983_s20, %s1044_s22  ;;  %p124_p0 = scmp.ne.s32.totalorder %s979_s19, %s975_s18 }
   0x8   : > { %p112_p1 = scmp.eq.s32.totalorder %s111_s24, 0  ;;  %p125_p2 = scmp.eq.s32.totalorder %s1040_s3, 1 }
   0x9   : > { %p130_p3 = scmp.ne.s32.totalorder %s975_s18, %s971_s17  ;;  %p131_p4 = scmp.eq.s32.totalorder %s717_s21, 1 }
   0xa   : > { %s1055_s25 = scalar_select %p112_p1, %s979_s19, %s114_s23  }
   0xb   : > { %p1057_p5 = por %p125_p2, %p124_p0  ;;  %p1061_p6 = por %p131_p4, %p130_p3 }
   0xc   : > { %p720_p7 = scmp.ge.s32.totalorder %s983_s20, 1  ;;  %p166_p8 = scmp.lt.s32.totalorder %s983_s20, 3 }
   0xe   : > { %p167_p9 = pnand %p720_p7, %p166_p8 }
   0xf   : > { %p192_p10 = scmp.lt.s32.totalorder (!%p167_p9), %s1040_s3, 1  ;;  %v855_v0 = vld [vmem:[%s1262_s1] sm:$0xff] (!%p167_p9)   ;;  %vm240_vm0 = vcmask (!%p167_p9), 130048   ;;  %v985_v2 = vmov (!%p167_p9), 0   ;;  %v207_v3 = vld [vmem:[%s1263_s2 + $0x8] sm:$0xff] (!%p167_p9)  ;;  %vm339_vm1 = vcmask (!%p167_p9), 1043456  }
  0x10   : > { %170 = sbr.rel (%p167_p9) target bundleno = 1183 (0x49f), region = 36  ;;  %766 = vmatprep.mubr.msk.bf16.mxu1 (!%p167_p9), %vm240_vm0, %v855_v0  ;;  %v206_v1 = vld [vmem:[%s1263_s2] sm:$0xff] (!%p167_p9)  ;;  %853 = vset.pattern.permute.xlu0 (!%p167_p9), %v985_v2  ;;  %v856_v7 = vld [vmem:[%s1262_s1 + $0x8] sm:$0xff] (!%p167_p9)   ;;  %vm314_vm2 = vcmask (!%p167_p9), 64512   ;;  %vm987_vm3 = vmmov (!%p167_p9), 0   ;;  %s198_s24 = sld [smem:[#allocation2]] (!%p167_p9) }
  0x11   : > { %212 = vperm.xlu0 (!%p167_p9), %853, %v206_v1   ;;  %s189_s28 = sand.u32 (!%p167_p9), 1, %s975_s18   ;;  %s742_s6 = sshll.u32 (!%p167_p9), %s1040_s3, 8 }
  0x12   : > { %s721_s29 = sshll.u32 (!%p167_p9), %s189_s28, 4  ;;  %s1218_s9 = scalar_lea.hbm (!%p167_p9), %s1265_s4, %s742_s6 }
  0x13   : > { %s988_s11 = smov (!%p167_p9), [#allocation3]  }
  0x14   : > { %s925_s12 = sshll.u32 (!%p167_p9), %s988_s11, 4  ;;  %s926_s12 = int_to_ptr.vmem [resolvable:$false] %s925_s12 }
  0x15   : > { %217 = vperm.xlu0 (!%p167_p9), %853, %v207_v3   ;;  %s927_s13 = scalar_lea.vmem (!%p167_p9), %s926_s12, 512 }
  0x17   : > { %s193_s30 = scalar_select %p192_p10, %s1040_s3, 1 }
  0x19   : > { %s741_s7 = sshll.u32 %s193_s30, 4  ;;  %s191_s30 = scalar_lea.vmem [#allocation3], %s721_s29 }
  0x1a   : > { %s196_s10 = scalar_lea.vmem %s1261_s0, %s741_s7  ;;  %s655_s5 = sshll.u32 %s191_s30, 4  ;;  %s1212_s5 = int_to_ptr.vmem [resolvable:$true] %s655_s5 }
  0x1b   : > { %v1082_v4 = vld [vmem:[%s196_s10] sm:$0xff]  ;;  %v1084_v5 = vld [vmem:[%s196_s10 + $0x8] sm:$0xff]  ;;  %s1220_s10 = scalar_lea.sflag [#allocation4], %s189_s28  ;;  %s921_s3 = scalar_lea.vmem %s1212_s5, 256 }
  0x1c   : > { %v201_v6 = vpack.c.bf16 %v1084_v5, %v1082_v4  ;;  %p922_p11 = scmp.ne.s32.totalorder %s1212_s5, %s921_s3  ;;  %p928_p0 = scmp.lt.s32.totalorder %s1212_s5, %s926_s12 }
  0x1d   : > { %p929_p1 = scmp.lt.s32.totalorder %s927_s13, %s921_s3 }
  0x1e   : > { %764 = vmatprep.subr.bf16.mxu1 %v201_v6  ;;  %p923_p12 = pnand %p922_p11, %p1057_p5 }
  0x1f   : > { %765 = vmatpush3.bf16.msra.mxu1 %v201_v6  ;;  %p930_p2 = por %p929_p1, %p928_p0 }
  0x20   : > { %p924_p13 = pneg %p923_p12 }
  0x22   : > { %767 = vmatmul.mubr.msk.bf16.vlgmr.msra.gmra.mrb[0].mxu1 %vm240_vm0, %v856_v7  ;;  %p931_p3 = pnand %p930_p2, %p924_p13 }
  0x90   : > { %v213_v8 = vpop.permute.xlu0 %212 }
  0x94   : > { %v218_v13 = vpop.permute.xlu0 %217 }
  0xf5   : > { %v1092_v9 = vpop.f32.mrb[0].mxu1 }
  0xf6   : > { %v281_v10 = vpop.f32.mrb[1].mxu1 }
  0xf7   : > { %v1094_v11 = vpop.f32.mrb[2].mxu1  ;;  %v282_v12 = vadd.f32 %v281_v10, %v213_v8 }
  0xf8   : > { %v284_v14 = vpop.f32.mrb[3].mxu1 }
  0xf9   : > { %v285_v15 = vadd.f32 %v284_v14, %v218_v13  ;;  %v296_v16 = vpack.c.bf16 %v282_v12, %v282_v12 }
  0xfb   : > { %v297_v17 = vpack.c.bf16 %v285_v15, %v285_v15  ;;  %298 = vxpose.xlu1.c.b16.start.end [1/1] (short) %v296_v16, 128 }
  0xfd   : > { %v341_v18 = vsel %vm339_vm1, %v297_v17, 0  ;;  %808 = vmatprep.subr.msk.bf16.mxu1 %vm339_vm1, %v297_v17 }
  0xfe   : > { %771 = vmatpush3.bf16.msra.mxu1 %v341_v18 }
  0xff   : > { %854 = vset.pattern.permute.xlu1 %v985_v2 }
 0x161   : > { %v306_v19 = vpop.trf.xlu1 }
 0x162   : > { %772 = vmatprep.mubr.msk.bf16.mxu1 %vm314_vm2, %v306_v19 }
 0x165   : > { %v307_v20 = vpop.trf.xlu1 }
 0x166   : > { %773 = vmatmul.mubr.msk.bf16.vlgmr.msra.gmra.mrb[4].mxu1 %vm314_vm2, %v307_v20 }
 0x169   : > { %v308_v21 = vpop.trf.xlu1 }
 0x16a   : > { %776 = vmatprep.mubr.msk.bf16.mxu1 %vm314_vm2, %v308_v21 }
 0x16d   : > { %v309_v22 = vpop.trf.xlu1 }
 0x16e   : > { %777 = vmatmul.mubr.msk.bf16.gmra.mrb[8].mxu1 %vm314_vm2, %v309_v22 }
 0x171   : > { %v310_v23 = vpop.trf.xlu1 }
 0x172   : > { %780 = vmatprep.mubr.msk.bf16.mxu1 %vm314_vm2, %v310_v23 }
 0x175   : > { %v311_v24 = vpop.trf.xlu1 }
 0x176   : > { %781 = vmatmul.mubr.msk.bf16.gmra.mrb[12].mxu1 %vm314_vm2, %v311_v24 }
 0x179   : > { %v312_v25 = vpop.trf.xlu1 }
 0x17a   : > { %784 = vmatprep.mubr.msk.bf16.mxu1 %vm314_vm2, %v312_v25 }
 0x17d   : > { %v313_v26 = vpop.trf.xlu1 }
 0x17e   : > { %785 = vmatmul.mubr.msk.bf16.gmra.mrb[16].mxu1 %vm314_vm2, %v313_v26 }
 0x239   : > { %v774_v27 = vpop.f32.mrb[4].mxu1 }
 0x23a   : > { %v377_v28 = vpop.f32.mrb[5].mxu1 }
 0x23b   : > { %440 = vmax.xlane.f32.xlu1 %v377_v28  ;;  %v775_v29 = vpop.f32.mrb[6].mxu1 }
 0x23c   : > { %v380_v30 = vpop.f32.mrb[7].mxu1 }
 0x23d   : > { %442 = vmax.xlane.f32.xlu0 %v380_v30 }
 0x241   : > { %444 = vmax.xlane.f32.xlu0 %v774_v27  ;;  %v778_v31 = vpop.f32.mrb[8].mxu1 }
 0x242   : > { %v393_v32 = vpop.f32.mrb[9].mxu1 }
 0x243   : > { %448 = vmax.xlane.f32.xlu1 %v393_v32  ;;  %v779_v33 = vpop.f32.mrb[10].mxu1 }
 0x244   : > { %v396_v34 = vpop.f32.mrb[11].mxu1 }
 0x245   : > { %446 = vmax.xlane.f32.xlu0 %v775_v29 }
 0x247   : > { %452 = vmax.xlane.f32.xlu1 %v778_v31 }
 0x249   : > { %450 = vmax.xlane.f32.xlu0 %v396_v34  ;;  %v782_v35 = vpop.f32.mrb[12].mxu1 }
 0x24a   : > { %v409_v36 = vpop.f32.mrb[13].mxu1 }
 0x24b   : > { %456 = vmax.xlane.f32.xlu1 %v409_v36  ;;  %v1104_v37 = vpop.f32.mrb[14].mxu1 }
 0x24c   : > { %v1106_v38 = vpop.f32.mrb[15].mxu1 }
 0x24d   : > { %454 = vmax.xlane.f32.xlu0 %v779_v33 }
 0x24f   : > { %460 = vmax.xlane.f32.xlu1 %v782_v35 }
 0x251   : > { %458 = vmax.xlane.f32.xlu0 %v1106_v38  ;;  %v1109_v39 = vpop.f32.mrb[16].mxu1 }
 0x252   : > { %v1111_v40 = vpop.f32.mrb[17].mxu1 }
 0x253   : > { %464 = vmax.xlane.f32.xlu1 %v1111_v40  ;;  %v1114_v41 = vpop.f32.mrb[18].mxu1 }
 0x254   : > { %v1116_v42 = vpop.f32.mrb[19].mxu1 }
 0x255   : > { %462 = vmax.xlane.f32.xlu0 %v1104_v37 }
 0x257   : > { %468 = vmax.xlane.f32.xlu1 %v1109_v39 }
 0x259   : > { %466 = vmax.xlane.f32.xlu0 %v1116_v42 }
 0x25d   : > { %470 = vmax.xlane.f32.xlu0 %v1114_v41 }
 0x2c8   : > { %v441_v43 = vpop.xlane.xlu1 %440 }
 0x2c9   : > { %v472_v44 = vsub.f32 %v377_v28, %v441_v43 }
 0x2ca   : > { %v443_v45 = vpop.xlane.xlu0 %442 }
 0x2cb   : > { %v488_v46 = vmul.f32 1.442695, %v472_v44  ;;  %v473_v47 = vsub.f32 %v380_v30, %v443_v45  ;;  %v986_v45 = vmov 0.0  }
 0x2cc   : > { %788 = vmatprep.subr.bf16.mxu0 %v986_v45  ;;  %804 = vmatprep.mubr.msk.bf16.mxu0 %vm987_vm3, %v986_v45 }
 0x2cd   : > { %857 = vpow2.f32 %v488_v46  ;;  %v490_v48 = vmul.f32 1.442695, %v473_v47 }
 0x2ce   : > { %v445_v49 = vpop.xlane.xlu0 %444 }
 0x2cf   : > { %859 = vpow2.f32 %v490_v48  ;;  %v474_v50 = vsub.f32 %v774_v27, %v445_v49  ;;  %v208_v48 = vld [vmem:[%s1263_s2 + $0x10] sm:$0xff]  ;;  %v209_v49 = vld [vmem:[%s1263_s2 + $0x18] sm:$0xff] }
 0x2d0   : > { %v449_v51 = vpop.xlane.xlu1 %448 }
 0x2d1   : > { %v492_v52 = vmul.f32 1.442695, %v474_v50  ;;  %v476_v53 = vsub.f32 %v393_v32, %v449_v51 }
 0x2d2   : > { %v447_v54 = vpop.xlane.xlu0 %446 }
 0x2d3   : > { %861 = vpow2.f32 %v492_v52  ;;  %v496_v55 = vmul.f32 1.442695, %v476_v53  ;;  %v475_v56 = vsub.f32 %v775_v29, %v447_v54 }
 0x2d4   : > { %v453_v57 = vpop.xlane.xlu1 %452 }
 0x2d5   : > { %v494_v58 = vmul.f32 1.442695, %v475_v56  ;;  %v478_v59 = vsub.f32 %v778_v31, %v453_v57  ;;  %863 = vpow2.f32 %v496_v55 }
 0x2d6   : > { %v451_v60 = vpop.xlane.xlu0 %450 }
 0x2d7   : > { %v1122_v61 = vpop.eup %857  ;;  %865 = vpow2.f32 %v494_v58  ;;  %v500_v62 = vmul.f32 1.442695, %v478_v59  ;;  %v477_v63 = vsub.f32 %v396_v34, %v451_v60 }
 0x2d8   : > { %520 = vadd.xlane.f32.xlu1 %v1122_v61  ;;  %v457_v0 = vpop.xlane.xlu1 %456 }
 0x2d9   : > { %v1125_v1 = vpop.eup %859  ;;  %v498_v2 = vmul.f32 1.442695, %v477_v63  ;;  %v480_v3 = vsub.f32 %v409_v36, %v457_v0  ;;  %867 = vpow2.f32 %v500_v62 }
 0x2da   : > { %v455_v6 = vpop.xlane.xlu0 %454  ;;  %522 = vadd.xlane.f32.xlu0 %v1125_v1 }
 0x2db   : > { %869 = vpow2.f32 %v498_v2  ;;  %v504_v7 = vmul.f32 1.442695, %v480_v3  ;;  %v479_v8 = vsub.f32 %v779_v33, %v455_v6 }
 0x2dc   : > { %v461_v10 = vpop.xlane.xlu1 %460 }
 0x2dd   : > { %v1128_v12 = vpop.eup %861  ;;  %v502_v13 = vmul.f32 1.442695, %v479_v8  ;;  %v482_v14 = vsub.f32 %v782_v35, %v461_v10  ;;  %871 = vpow2.f32 %v504_v7 }
 0x2de   : > { %v459_v15 = vpop.xlane.xlu0 %458  ;;  %524 = vadd.xlane.f32.xlu1 %v1128_v12 }
 0x2df   : > { %873 = vpow2.f32 %v502_v13  ;;  %v508_v16 = vmul.f32 1.442695, %v482_v14  ;;  %v481_v17 = vsub.f32 %v1106_v38, %v459_v15  ;;  %v1132_v18 = vpop.eup %863 }
 0x2e0   : > { %v465_v19 = vpop.xlane.xlu1 %464 }
 0x2e1   : > { %v1134_v20 = vpop.eup %865  ;;  %v506_v21 = vmul.f32 1.442695, %v481_v17  ;;  %875 = vpow2.f32 %v508_v16  ;;  %v484_v27 = vsub.f32 %v1111_v40, %v465_v19 }
 0x2e2   : > { %v463_v22 = vpop.xlane.xlu0 %462  ;;  %526 = vadd.xlane.f32.xlu0 %v1134_v20  ;;  %528 = vadd.xlane.f32.xlu1 %v1132_v18 }
 0x2e3   : > { %877 = vpow2.f32 %v506_v21  ;;  %v483_v23 = vsub.f32 %v1104_v37, %v463_v22  ;;  %v1139_v24 = vpop.eup %867  ;;  %v512_v35 = vmul.f32 1.442695, %v484_v27 }
 0x2e4   : > { %v469_v25 = vpop.xlane.xlu1 %468 }
 0x2e5   : > { %v1141_v26 = vpop.eup %869  ;;  %v510_v28 = vmul.f32 1.442695, %v483_v23  ;;  %v486_v29 = vsub.f32 %v1109_v39, %v469_v25 }
 0x2e6   : > { %530 = vadd.xlane.f32.xlu0 %v1141_v26  ;;  %v467_v30 = vpop.xlane.xlu0 %466  ;;  %532 = vadd.xlane.f32.xlu1 %v1139_v24 }
 0x2e7   : > { %879 = vpow2.f32 %v510_v28  ;;  %v516_v31 = vmul.f32 1.442695, %v486_v29  ;;  %v485_v32 = vsub.f32 %v1116_v42, %v467_v30  ;;  %v1148_v33 = vpop.eup %871 }
 0x2e9   : > { %v1150_v34 = vpop.eup %873  ;;  %881 = vpow2.f32 %v516_v31  ;;  %v514_v36 = vmul.f32 1.442695, %v485_v32 }
 0x2ea   : > { %534 = vadd.xlane.f32.xlu0 %v1150_v34  ;;  %v471_v37 = vpop.xlane.xlu0 %470  ;;  %536 = vadd.xlane.f32.xlu1 %v1148_v33 }
 0x2eb   : > { %883 = vpow2.f32 %v514_v36  ;;  %v487_v38 = vsub.f32 %v1114_v41, %v471_v37  ;;  %v1155_v39 = vpop.eup %875 }
 0x2ec   : > { %885 = vpow2.f32 %v512_v35 }
 0x2ed   : > { %v1157_v40 = vpop.eup %877  ;;  %v518_v42 = vmul.f32 1.442695, %v487_v38 }
 0x2ee   : > { %538 = vadd.xlane.f32.xlu0 %v1157_v40  ;;  %540 = vadd.xlane.f32.xlu1 %v1155_v39 }
 0x2ef   : > { %887 = vpow2.f32 %v518_v42 }
 0x2f1   : > { %v1161_v43 = vpop.eup %879 }
 0x2f2   : > { %542 = vadd.xlane.f32.xlu0 %v1161_v43 }
 0x2f3   : > { %v1164_v44 = vpop.eup %881 }
 0x2f4   : > { %548 = vadd.xlane.f32.xlu1 %v1164_v44 }
 0x2f5   : > { %v1167_v41 = vpop.eup %883 }
 0x2f6   : > { %546 = vadd.xlane.f32.xlu0 %v1167_v41  ;;  %v1171_v46 = vpop.eup %885 }
 0x2f8   : > { %544 = vadd.xlane.f32.xlu1 %v1171_v46 }
 0x2f9   : > { %v1174_v47 = vpop.eup %887 }
 0x2fa   : > { %550 = vadd.xlane.f32.xlu0 %v1174_v47 }
 0x309   : > { %222 = vperm.xlu1 %854, %v208_v48  }
 0x310   : > { %227 = vperm.xlu0 %853, %v209_v49  }
 0x365   : > { %v521_v50 = vpop.xlane.xlu1 %520 }
 0x366   : > { %889 = vrcp.f32 %v521_v50 }
 0x367   : > { %v523_v51 = vpop.xlane.xlu0 %522 }
 0x368   : > { %891 = vrcp.f32 %v523_v51 }
 0x36b   : > { %v525_v52 = vpop.xlane.xlu1 %524 }
 0x36c   : > { %893 = vrcp.f32 %v525_v52 }
 0x36f   : > { %v527_v53 = vpop.xlane.xlu0 %526  ;;  %v529_v54 = vpop.xlane.xlu1 %528 }
 0x370   : > { %v890_v55 = vpop.eup %889  ;;  %895 = vrcp.f32 %v527_v53 }
 0x371   : > { %v568_v59 = vmul.f32 %v890_v55, %v1122_v61 }
 0x372   : > { %v892_v56 = vpop.eup %891 }
 0x373   : > { %v531_v57 = vpop.xlane.xlu0 %530  ;;  %v533_v58 = vpop.xlane.xlu1 %532  ;;  %v569_v60 = vmul.f32 %v892_v56, %v1125_v1 }
 0x374   : > { %897 = vrcp.f32 %v531_v57 }
 0x375   : > { %v585_v62 = vpack.c.bf16 %v569_v60, %v568_v59  ;;  %899 = vrcp.f32 %v529_v54 }
 0x376   : > { %v894_v2 = vpop.eup %893 }
 0x377   : > { %v535_v63 = vpop.xlane.xlu0 %534  ;;  %789 = vmatpush3.bf16.xpose.msra.mxu0 %v585_v62  ;;  %v537_v0 = vpop.xlane.xlu1 %536  ;;  %v570_v7 = vmul.f32 %v894_v2, %v1128_v12 }
 0x378   : > { %790 = vmatprep.subr.bf16.mxu0 %v986_v45  ;;  %901 = vrcp.f32 %v535_v63 }
 0x379   : > { %903 = vrcp.f32 %v533_v58 }
 0x37a   : > { %v896_v3 = vpop.eup %895 }
 0x37b   : > { %v539_v6 = vpop.xlane.xlu0 %538  ;;  %v571_v8 = vmul.f32 %v896_v3, %v1134_v20  ;;  %v541_v10 = vpop.xlane.xlu1 %540 }
 0x37c   : > { %905 = vrcp.f32 %v539_v6 }
 0x37d   : > { %v586_v61 = vpack.c.bf16 %v571_v8, %v570_v7  ;;  %907 = vrcp.f32 %v537_v0 }
 0x37e   : > { %v898_v13 = vpop.eup %897 }
 0x37f   : > { %v543_v1 = vpop.xlane.xlu0 %542  ;;  %791 = vmatpush3.bf16.xpose.msra.mxu0 %v586_v61  ;;  %v900_v14 = vpop.eup %899  ;;  %v573_v16 = vmul.f32 %v898_v13, %v1141_v26 }
 0x380   : > { %792 = vmatprep.subr.bf16.mxu0 %v986_v45  ;;  %v572_v17 = vmul.f32 %v900_v14, %v1132_v18  ;;  %909 = vrcp.f32 %v543_v1 }
 0x381   : > { %v549_v15 = vpop.xlane.xlu1 %548  ;;  %911 = vrcp.f32 %v541_v10 }
 0x382   : > { %v587_v12 = vpack.c.bf16 %v573_v16, %v572_v17  ;;  %v902_v21 = vpop.eup %901 }
 0x383   : > { %v547_v19 = vpop.xlane.xlu0 %546  ;;  %v904_v22 = vpop.eup %903  ;;  %v575_v23 = vmul.f32 %v902_v21, %v1150_v34 }
 0x384   : > { %v574_v27 = vmul.f32 %v904_v22, %v1139_v24 }
 0x385   : > { %v545_v20 = vpop.xlane.xlu1 %544 }
 0x386   : > { %v588_v26 = vpack.c.bf16 %v575_v23, %v574_v27  ;;  %v906_v29 = vpop.eup %905  ;;  %913 = vrcp.f32 %v545_v20 }
 0x387   : > { %793 = vmatpush3.bf16.xpose.msra.mxu0 %v587_v12  ;;  %v551_v25 = vpop.xlane.xlu0 %550  ;;  %v908_v30 = vpop.eup %907  ;;  %v577_v35 = vmul.f32 %v906_v29, %v1157_v40  ;;  %915 = vrcp.f32 %v547_v19 }
 0x388   : > { %794 = vmatprep.subr.bf16.mxu0 %v986_v45  ;;  %v576_v36 = vmul.f32 %v908_v30, %v1148_v33  ;;  %917 = vrcp.f32 %v551_v25 }
 0x389   : > { %v223_v28 = vpop.permute.xlu1 %222  ;;  %919 = vrcp.f32 %v549_v15 }
 0x38a   : > { %v290_v31 = vadd.f32 %v1092_v9, %v223_v28  ;;  %v589_v24 = vpack.c.bf16 %v577_v35, %v576_v36  ;;  %v910_v37 = vpop.eup %909 }
 0x38b   : > { %v912_v38 = vpop.eup %911  ;;  %v579_v42 = vmul.f32 %v910_v37, %v1161_v43 }
 0x38c   : > { %v578_v9 = vmul.f32 %v912_v38, %v1155_v39 }
 0x38f   : > { %v228_v18 = vpop.permute.xlu0 %227  ;;  %795 = vmatpush3.bf16.xpose.msra.mxu0 %v588_v26 }
 0x390   : > { %v293_v32 = vadd.f32 %v1094_v11, %v228_v18  ;;  %796 = vmatprep.subr.bf16.mxu0 %v986_v45  ;;  %v590_v11 = vpack.c.bf16 %v579_v42, %v578_v9  ;;  %v914_v48 = vpop.eup %913 }
 0x391   : > { %v916_v40 = vpop.eup %915  ;;  %v580_v33 = vmul.f32 %v914_v48, %v1171_v46  ;;  %v634_v46 = vstv %s198_s24 }
 0x392   : > { %v584_v34 = vpack.c.bf16 %v293_v32, %v290_v31  ;;  %v581_v49 = vmul.f32 %v916_v40, %v1167_v41  ;;  %v918_v51 = vpop.eup %917 }
 0x393   : > { %v920_v52 = vpop.eup %919  ;;  %v583_v39 = vmul.f32 %v918_v51, %v1174_v47 }
 0x394   : > { %v591_v50 = vpack.c.bf16 %v581_v49, %v580_v33  ;;  %v582_v43 = vmul.f32 %v920_v52, %v1164_v44 }
 0x396   : > { %v592_v53 = vpack.c.bf16 %v583_v39, %v582_v43 }
 0x397   : > { %797 = vmatpush3.bf16.xpose.msra.mxu0 %v589_v24 }
 0x398   : > { %798 = vmatprep.subr.bf16.mxu0 %v986_v45 }
 0x39f   : > { %799 = vmatpush3.bf16.xpose.msra.mxu0 %v590_v11 }
 0x3a0   : > { %800 = vmatprep.subr.bf16.mxu0 %v986_v45 }
 0x3a7   : > { %801 = vmatpush3.bf16.xpose.msra.mxu0 %v591_v50 }
 0x3a8   : > { %802 = vmatprep.subr.bf16.mxu0 %v986_v45 }
 0x3af   : > { %803 = vmatpush3.bf16.xpose.msra.mxu0 %v592_v53 }
 0x3b6   : > { %805 = vmatmul.mubr.bf16.vlgmr.msra.gmra.mrb[0].mxu0 %v584_v34 }
 0x489   : > { %v627_v54 = vpop.f32.mrb[0].mxu0 }
 0x48a   : > { %v635_v41 = vmul.f32 %v634_v46, %v627_v54  ;;  %v806_v55 = vpop.f32.mrb[1].mxu0 }
 0x48b   : > { %v630_v56 = vpop.f32.mrb[2].mxu0 }
 0x48c   : > { %v637_v45 = vadd.f32 %v635_v41, %v1082_v4  ;;  %v636_v47 = vmul.f32 %v634_v46, %v630_v56  ;;  %v807_v57 = vpop.f32.mrb[3].mxu0 }
 0x48e   : > { %639 = vst [vmem:[%s191_s30] sm:$0xff] %v637_v45  ;;  %v638_v44 = vadd.f32 %v636_v47, %v1084_v5 }
 0x490   : > { %640 = vst [vmem:[%s191_s30 + $0x8] sm:$0xff] %v638_v44 }
 0x491   : > { %934 = shalt.err (!%p931_p3)
}
 0x492   : > { %s935_s14 = scalar_lea.hbm %s1218_s9, 256  ;;  %s939_s21 = scalar_lea.hbm %s1265_s4, 512 }
 0x493   : > { %p936_p4 = scmp.ne.s32.totalorder %s1218_s9, %s935_s14  ;;  %p940_p9 = scmp.lt.u32.totalorder %s1218_s9, %s1265_s4 }
 0x494   : > { %p941_p10 = scmp.lt.u32.totalorder %s939_s21, %s935_s14  ;;  %p943_p12 = scmp.lt.u32.totalorder %s935_s14, %s1218_s9 }
 0x495   : > { %p937_p7 = pnand %p936_p4, %p1057_p5 }
 0x496   : > { %p942_p11 = por %p941_p10, %p940_p9 }
 0x497   : > { %p938_p8 = pneg %p937_p7 }
 0x498   : > { %p944_p13 = por %p943_p12, %p942_p11 }
 0x49a   : > { %p945_p0 = pnand %p944_p13, %p938_p8 }
 0x49c   : > { %948 = shalt.err (!%p945_p0)
}
 0x49d   : > { %s989_s28 = smov 128   ;;  %s990_s29 = smov 8  }
 0x49e   : > { %809 = dma.vmem_to_hbm [thread:$0]  (%p1057_p5), %s1212_s5, 256, %s1218_s9, %s1220_s10, %s989_s28, %s989_s28, %s990_s29  }
 0x49f PF: > { %p815_p1 = scmp.ge.s32.totalorder %s983_s20, 2  ;;  %s670_s30 = sand.u32 1, %s971_s17  }
 0x4a0   : > { %s671_s6 = scalar_lea.sflag [#allocation4], %s670_s30 }
 0x4a1   : > { %p812_p2 = pnand %p815_p1, %p1061_p6 }
 0x4a3   : > { %966 = dma.done.wait (!%p812_p2), %s671_s6, 256  }
 0x4a4   : > { %968 = vsyncadd (!%p812_p2), %s671_s6, 4294967040  ;;  %p15_p3 = scmp.ge.s32.totalorder %s1044_s22, 4   ;;  %s1268_s17 = smov %s975_s18 }
 0x4a5   : > { %s1269_s18 = smov %s979_s19  ;;  %s1270_s19 = smov %s1055_s25 }
 0x4a6   : > { %s1271_s20 = smov %s1044_s22  ;;  %17 = sbr.rel (!%p15_p3) target bundleno = 5 (0x5), region = 71 }
 0x4ad   :  { %676 = vsyncpa [#allocation4], 1 }
 0x4ae   :  { %678 = vsyncpa [#allocation4 + $0x1], 1 }

</bundles_post_ra>
